<compile_context>
chip_gen: v6e
topology: v6e:2x2x1
jax: 0.10.0
libtpu: 0.0.40
codegen_flags: <defaults>
</compile_context>

<pallas_src>
import jax
import jax.numpy as jnp
from jax.experimental import pallas as pl
from jax.experimental.pallas import tpu as pltpu

MASK_VALUE = -1e30  # finite mask value: masked positions get exactly 0 attention;
                    # a fully-masked row degrades to uniform weights instead of NaN.


def _round_up(x, m):
    return ((x + m - 1) // m) * m


def _plan_tiles(B, L, H, A, O):
    """Pick (batch tile TB, sequence chunk LC, vmem_limit_bytes) from the chip's VMEM.

    Accounts for lane (128) / sublane (8) padding of every VMEM-resident buffer:
    the double-buffered f32 hidden block, the per-chunk bf16 cast, the f32 a1
    intermediate, the weighted-hidden temporary, scores/attn, outputs and the
    resident weights.
    """
    try:
        cap = int(pltpu.get_tpu_info().vmem_capacity_bytes)
    except Exception:
        cap = 64 * 1024 * 1024  # conservative (v7x per-TC) fallback
    vmem_limit = min(cap * 3 // 4, 110 * 1024 * 1024)

    LC = L if L <= 512 else 512  # sequence chunk for the in-kernel row loop

    def pad2(rows, cols, itemsize):
        return _round_up(rows, 8) * _round_up(cols, 128) * itemsize

    L8, L128 = _round_up(L, 8), _round_up(L, 128)
    LC8 = _round_up(LC, 8)
    H128, A128, O128 = _round_up(H, 128), _round_up(A, 128), _round_up(O, 128)

    # resident weights (counted double-buffered, conservatively)
    weight_bytes = 2 * (pad2(H, A, 2) + pad2(1, A, 4) + pad2(1, A, 4)
                        + pad2(H, O, 2) + pad2(1, O, 4))

    per_row = (
        2 * L8 * H128 * 4        # hidden f32 block, double-buffered
        + 2 * L128 * 4           # mask block, double-buffered
        + LC8 * H128 * 2         # bf16 cast of the current hidden chunk
        + 2 * LC8 * A128 * 4     # a1 / tanh intermediates (f32, lane-padded)
        + LC8 * H128 * 4         # weighted-hidden temporary in the context pass
        + 6 * L128 * 4           # scores / exp / attn working copies
        + 2 * L128 * 4           # attn output block, double-buffered
        + 2 * O128 * 4           # predict output block, double-buffered
        + H128 * 4 + H128 * 2    # context f32 + bf16 cast
    )
    budget = max(vmem_limit - weight_bytes - (8 << 20), 4 << 20)  # 8 MiB headroom
    tb = budget // max(per_row, 1)
    tb = max(8, min(1024, (tb // 8) * 8))
    if B <= tb:
        tb = B                   # single partial-free block; equals-full-dim is legal
    return tb, LC, vmem_limit


def _make_attn_decoder_kernel(l_chunk):
    def attn_decoder_kernel(hidden_ref, mask_ref, w1_ref, b1_ref, w2_ref,
                            wmain_ref, bmain_ref, attn_ref, predict_ref):
        TB, L, H = hidden_ref.shape
        A = w1_ref.shape[1]
        n_chunks = (L + l_chunk - 1) // l_chunk

        # --- pass 1: attention logits, chunked over the sequence axis ---------
        # bf16 cast happens here (in-register), only for the MXU matmul inputs.
        score_chunks = []
        for c in range(n_chunks):
            c0 = c * l_chunk
            lc = min(l_chunk, L - c0)
            h_chunk = hidden_ref[:, c0:c0 + lc, :]                     # (TB, lc, H) f32
            h2d = h_chunk.reshape(TB * lc, H).astype(jnp.bfloat16)
            a1 = jnp.tanh(
                jnp.dot(h2d, w1_ref[...], preferred_element_type=jnp.float32)
                + b1_ref[...])                                         # (TB*lc, A) f32
            # w2 as a (1, A) row: VPU multiply + lane reduction (no N=1 MXU matmul).
            score_chunks.append(
                jnp.sum(a1.reshape(TB, lc, A) * w2_ref[...], axis=-1))  # (TB, lc)
        scores = (score_chunks[0] if n_chunks == 1
                  else jnp.concatenate(score_chunks, axis=-1))          # (TB, L)

        # --- masked softmax over the sequence axis -----------------------------
        mask = mask_ref[...]                                            # 1.0 = pad
        scores = jnp.where(mask > 0, MASK_VALUE, scores)
        m = jnp.max(scores, axis=-1, keepdims=True)
        e = jnp.exp(scores - m)
        denom = jnp.sum(e, axis=-1, keepdims=True)
        attn = e * pl.reciprocal(denom, approx=False)                   # exact norm
        attn_ref[...] = attn

        # --- context = sum_L attn * hidden (VPU mul + XLU reduce, chunked) -----
        # f32 math everywhere (safe on v5e: no bf16 VPU there).
        context = jnp.zeros((TB, H), jnp.float32)
        for c in range(n_chunks):
            c0 = c * l_chunk
            lc = min(l_chunk, L - c0)
            h_chunk = hidden_ref[:, c0:c0 + lc, :]                      # (TB, lc, H) f32
            a_chunk = attn[:, c0:c0 + lc]                               # (TB, lc)
            context = context + jnp.sum(a_chunk[:, :, None] * h_chunk, axis=1)

        # --- final linear: bf16 MXU inputs, f32 accumulation -------------------
        predict_ref[...] = (
            jnp.dot(context.astype(jnp.bfloat16), wmain_ref[...],
                    preferred_element_type=jnp.float32)
            + bmain_ref[...])                                           # (TB, O)
    return attn_decoder_kernel


def attn_decoder(hidden, masks, params):
    B, L, H = hidden.shape
    A = params["w1"].shape[1]
    O = params["w_main"].shape[1]

    TB, LC, vmem_limit = _plan_tiles(B, L, H, A, O)
    grid = (pl.cdiv(B, TB),)

    # Only the tiny weights are cast in the wrapper; hidden/masks go in unchanged.
    w1_p = params["w1"].astype(jnp.bfloat16)                 # (H, A)
    b1_p = params["b1"].astype(jnp.float32)                  # (1, A)
    w2_row = params["w2"].astype(jnp.float32).reshape(1, A)  # (A, 1) -> (1, A)
    w_main_p = params["w_main"].astype(jnp.bfloat16)         # (H, O)
    b_main_p = params["b_main"].astype(jnp.float32)          # (1, O)

    flops = int(2 * B * L * H * A + 2 * B * L * A + 2 * B * L * H + 2 * B * H * O)
    transcendentals = int(B * L * (A + 1))                   # tanh + exp
    bytes_accessed = int(hidden.size * hidden.dtype.itemsize
                         + masks.size * masks.dtype.itemsize
                         + w1_p.size * 2 + b1_p.size * 4 + w2_row.size * 4
                         + w_main_p.size * 2 + b_main_p.size * 4
                         + B * L * 4 + B * O * 4)

    attn, predict = pl.pallas_call(
        _make_attn_decoder_kernel(LC),
        out_shape=(jax.ShapeDtypeStruct((B, L), jnp.float32),
                   jax.ShapeDtypeStruct((B, O), jnp.float32)),
        grid_spec=pltpu.PrefetchScalarGridSpec(
            num_scalar_prefetch=0,
            grid=grid,
            in_specs=[
                pl.BlockSpec((TB, L, H), lambda b: (b, 0, 0)),  # hidden (tiled batch)
                pl.BlockSpec((TB, L), lambda b: (b, 0)),        # masks  (tiled batch)
                pl.BlockSpec((H, A), lambda b: (0, 0)),         # W1     (resident)
                pl.BlockSpec((1, A), lambda b: (0, 0)),         # b1
                pl.BlockSpec((1, A), lambda b: (0, 0)),         # w2 row
                pl.BlockSpec((H, O), lambda b: (0, 0)),         # W_main (resident)
                pl.BlockSpec((1, O), lambda b: (0, 0)),         # b_main
            ],
            out_specs=[
                pl.BlockSpec((TB, L), lambda b: (b, 0)),        # attn
                pl.BlockSpec((TB, O), lambda b: (b, 0)),        # predict
            ],
        ),
        compiler_params=pltpu.CompilerParams(
            dimension_semantics=("parallel",),        # batch axis independent per block
            vmem_limit_bytes=vmem_limit,              # generation-aware
        ),
        cost_estimate=pl.CostEstimate(flops=flops,
                                      transcendentals=transcendentals,
                                      bytes_accessed=bytes_accessed),
    )(hidden, masks, w1_p, b1_p, w2_row, w_main_p, b_main_p)

    return attn, predict


def reference(hidden, masks, params):
    """Pure-JAX reference mirroring the kernel's bf16 MXU-input rounding."""
    f32 = jnp.float32
    hb = hidden.astype(jnp.bfloat16).astype(f32)
    w1b = params["w1"].astype(jnp.bfloat16).astype(f32)
    a1 = jnp.tanh(jnp.einsum("blh,ha->bla", hb, w1b) + params["b1"][0])
    scores = jnp.einsum("bla,a->bl", a1, params["w2"][:, 0])
    scores = jnp.where(masks > 0, MASK_VALUE, scores)
    attn = jax.nn.softmax(scores, axis=-1)
    context = jnp.einsum("bl,blh->bh", attn, hidden.astype(f32))   # kernel: f32 path
    cb = context.astype(jnp.bfloat16).astype(f32)
    wmb = params["w_main"].astype(jnp.bfloat16).astype(f32)
    predict = cb @ wmb + params["b_main"][0]
    return attn, predict


if __name__ == "__main__":
    B, L, H, O = 2, 8, 32, 1
    A = H // 2  # TanhAttention intermediate size

    key = jax.random.PRNGKey(0)
    k_h, k_w1, k_b1, k_w2, k_wm, k_bm = jax.random.split(key, 6)

    hidden = jax.random.normal(k_h, (B, L, H), dtype=jnp.float32)
    # mask: 1.0 at padded positions; second sequence has its last 3 steps padded.
    masks = jnp.zeros((B, L), dtype=jnp.float32).at[1, L - 3:].set(1.0)

    params = {
        "w1":     0.1 * jax.random.normal(k_w1, (H, A), dtype=jnp.float32),
        "b1":     0.1 * jax.random.normal(k_b1, (1, A), dtype=jnp.float32),
        "w2":     0.1 * jax.random.normal(k_w2, (A, 1), dtype=jnp.float32),
        "w_main": 0.1 * jax.random.normal(k_wm, (H, O), dtype=jnp.float32),
        "b_main": 0.1 * jax.random.normal(k_bm, (1, O), dtype=jnp.float32),
    }

    attn, predict = attn_decoder(hidden, masks, params)
    jax.block_until_ready((attn, predict))

    attn_ref, predict_ref = reference(hidden, masks, params)
    assert jnp.allclose(attn, attn_ref, atol=1e-2, rtol=1e-2), "attn mismatch"
    assert jnp.allclose(predict, predict_ref, atol=2e-2, rtol=2e-2), "predict mismatch"
    # masked positions must get zero attention; rows sum to ~1
    assert jnp.allclose(attn[1, L - 3:], 0.0, atol=1e-6)
    assert jnp.allclose(attn.sum(-1), 1.0, atol=1e-3)

    print("KERNEL_OK")
</pallas_src>

<mosaic_0001>
module attributes {stable_mosaic.version = 11 : i64} {
  func.func @attn_decoder_kernel(%arg0: i32, %arg1: memref<2x8x32xf32, #tpu.memory_space<vmem>>, %arg2: memref<2x8xf32, #tpu.memory_space<vmem>>, %arg3: memref<32x16xbf16, #tpu.memory_space<vmem>>, %arg4: memref<1x16xf32, #tpu.memory_space<vmem>>, %arg5: memref<1x16xf32, #tpu.memory_space<vmem>>, %arg6: memref<32x1xbf16, #tpu.memory_space<vmem>>, %arg7: memref<1x1xf32, #tpu.memory_space<vmem>>, %arg8: memref<2x8xf32, #tpu.memory_space<vmem>>, %arg9: memref<2x1xf32, #tpu.memory_space<vmem>>) attributes {dimension_semantics = [#tpu.dimension_semantics<parallel>], iteration_bounds = array<i64: 1>, scalar_prefetch = 0 : i64, scratch_operands = 0 : i64, tpu.core_type = #tpu.core_type<tc>, window_params = [{transform_indices = @transform_0, window_bounds = array<i64: 2, 8, 32>}, {transform_indices = @transform_1, window_bounds = array<i64: 2, 8>}, {pipeline_mode = #tpu.pipeline_mode<synchronous>, transform_indices = @transform_2, window_bounds = array<i64: 32, 16>}, {pipeline_mode = #tpu.pipeline_mode<synchronous>, transform_indices = @transform_3, window_bounds = array<i64: 1, 16>}, {pipeline_mode = #tpu.pipeline_mode<synchronous>, transform_indices = @transform_4, window_bounds = array<i64: 1, 16>}, {pipeline_mode = #tpu.pipeline_mode<synchronous>, transform_indices = @transform_5, window_bounds = array<i64: 32, 1>}, {pipeline_mode = #tpu.pipeline_mode<synchronous>, transform_indices = @transform_6, window_bounds = array<i64: 1, 1>}, {transform_indices = @transform_7, window_bounds = array<i64: 2, 8>}, {transform_indices = @transform_8, window_bounds = array<i64: 2, 1>}]} {
    %c0 = arith.constant 0 : index
    %c0_0 = arith.constant 0 : index
    %c0_1 = arith.constant 0 : index
    %0 = vector.load %arg1[%c0, %c0_0, %c0_1] : memref<2x8x32xf32, #tpu.memory_space<vmem>>, vector<2x8x32xf32>
    %1 = vector.shape_cast %0 : vector<2x8x32xf32> to vector<16x32xf32>
    %2 = arith.truncf %1 : vector<16x32xf32> to vector<16x32xbf16>
    %c0_2 = arith.constant 0 : index
    %c0_3 = arith.constant 0 : index
    %3 = vector.load %arg3[%c0_2, %c0_3] : memref<32x16xbf16, #tpu.memory_space<vmem>>, vector<32x16xbf16>
    %cst = arith.constant dense<0.000000e+00> : vector<16x16xf32>
    %4 = tpu.matmul %2, %3, %cst {dimension_numbers = #tpu.dot_dimension_numbers<[1], [0], [0], [1], [0, 0, 1, 1], [], []>} : vector<16x32xbf16>, vector<32x16xbf16>, vector<16x16xf32> -> vector<16x16xf32>
    %c0_4 = arith.constant 0 : index
    %c0_5 = arith.constant 0 : index
    %5 = vector.load %arg4[%c0_4, %c0_5] : memref<1x16xf32, #tpu.memory_space<vmem>>, vector<1x16xf32>
    %6 = vector.broadcast %5 : vector<1x16xf32> to vector<16x16xf32>
    %7 = arith.addf %4, %6 : vector<16x16xf32>
    %8 = math.tanh %7 : vector<16x16xf32>
    %9 = vector.shape_cast %8 : vector<16x16xf32> to vector<2x8x16xf32>
    %c0_6 = arith.constant 0 : index
    %c0_7 = arith.constant 0 : index
    %10 = vector.load %arg5[%c0_6, %c0_7] : memref<1x16xf32, #tpu.memory_space<vmem>>, vector<1x16xf32>
    %11 = vector.shape_cast %10 : vector<1x16xf32> to vector<1x1x16xf32>
    %12 = vector.broadcast %11 : vector<1x1x16xf32> to vector<2x8x16xf32>
    %13 = arith.mulf %9, %12 : vector<2x8x16xf32>
    %cst_8 = arith.constant dense<0.000000e+00> : vector<2x8xf32>
    %14 = vector.multi_reduction <add>, %13, %cst_8 [2] : vector<2x8x16xf32> to vector<2x8xf32>
    %c0_9 = arith.constant 0 : index
    %c0_10 = arith.constant 0 : index
    %15 = vector.load %arg2[%c0_9, %c0_10] : memref<2x8xf32, #tpu.memory_space<vmem>>, vector<2x8xf32>
    %cst_11 = arith.constant 0.000000e+00 : f32
    %16 = vector.broadcast %cst_11 : f32 to vector<2x8xf32>
    %17 = arith.cmpf ogt, %15, %16 : vector<2x8xf32>
    %cst_12 = arith.constant -1.000000e+30 : f32
    %18 = vector.broadcast %cst_12 : f32 to vector<2x8xf32>
    %19 = arith.select %17, %18, %14 : vector<2x8xi1>, vector<2x8xf32>
    %cst_13 = arith.constant dense<0xFF800000> : vector<2xf32>
    %20 = vector.multi_reduction <maximumf>, %19, %cst_13 [1] : vector<2x8xf32> to vector<2xf32>
    %21 = vector.shape_cast %20 : vector<2xf32> to vector<2x1xf32>
    %22 = vector.broadcast %21 : vector<2x1xf32> to vector<2x8xf32>
    %23 = arith.subf %19, %22 : vector<2x8xf32>
    %24 = math.exp %23 : vector<2x8xf32>
    %cst_14 = arith.constant dense<0.000000e+00> : vector<2xf32>
    %25 = vector.multi_reduction <add>, %24, %cst_14 [1] : vector<2x8xf32> to vector<2xf32>
    %26 = vector.shape_cast %25 : vector<2xf32> to vector<2x1xf32>
    %27 = tpu.reciprocal %26 : vector<2x1xf32> -> vector<2x1xf32>
    %28 = vector.broadcast %27 : vector<2x1xf32> to vector<2x8xf32>
    %29 = arith.mulf %24, %28 : vector<2x8xf32>
    %c0_15 = arith.constant 0 : index
    %c0_16 = arith.constant 0 : index
    %30 = vector.load %arg8[%c0_15, %c0_16] : memref<2x8xf32, #tpu.memory_space<vmem>>, vector<2x8xf32>
    tpu.vector_store %arg8[%c0_15, %c0_16], %29 {strides = array<i32>} : memref<2x8xf32, #tpu.memory_space<vmem>>, vector<2x8xf32>,
    %cst_17 = arith.constant 0.000000e+00 : f32
    %31 = vector.broadcast %cst_17 : f32 to vector<2x32xf32>
    %c0_18 = arith.constant 0 : index
    %c0_19 = arith.constant 0 : index
    %c0_20 = arith.constant 0 : index
    %32 = vector.load %arg1[%c0_18, %c0_19, %c0_20] : memref<2x8x32xf32, #tpu.memory_space<vmem>>, vector<2x8x32xf32>
    %33 = vector.shape_cast %29 : vector<2x8xf32> to vector<2x8x1xf32>
    %34 = vector.broadcast %33 : vector<2x8x1xf32> to vector<2x8x32xf32>
    %35 = arith.mulf %34, %32 : vector<2x8x32xf32>
    %cst_21 = arith.constant dense<0.000000e+00> : vector<2x32xf32>
    %36 = vector.multi_reduction <add>, %35, %cst_21 [1] : vector<2x8x32xf32> to vector<2x32xf32>
    %37 = arith.addf %31, %36 : vector<2x32xf32>
    %38 = arith.truncf %37 : vector<2x32xf32> to vector<2x32xbf16>
    %c0_22 = arith.constant 0 : index
    %c0_23 = arith.constant 0 : index
    %39 = vector.load %arg6[%c0_22, %c0_23] : memref<32x1xbf16, #tpu.memory_space<vmem>>, vector<32x1xbf16>
    %cst_24 = arith.constant dense<0.000000e+00> : vector<2x1xf32>
    %40 = tpu.matmul %38, %39, %cst_24 {dimension_numbers = #tpu.dot_dimension_numbers<[1], [0], [0], [1], [0, 0, 1, 1], [], []>} : vector<2x32xbf16>, vector<32x1xbf16>, vector<2x1xf32> -> vector<2x1xf32>
    %c0_25 = arith.constant 0 : index
    %c0_26 = arith.constant 0 : index
    %41 = vector.load %arg7[%c0_25, %c0_26] : memref<1x1xf32, #tpu.memory_space<vmem>>, vector<1x1xf32>
    %42 = vector.broadcast %41 : vector<1x1xf32> to vector<2x1xf32>
    %43 = arith.addf %40, %42 : vector<2x1xf32>
    %c0_27 = arith.constant 0 : index
    %c0_28 = arith.constant 0 : index
    %44 = vector.load %arg9[%c0_27, %c0_28] : memref<2x1xf32, #tpu.memory_space<vmem>>, vector<2x1xf32>
    tpu.vector_store %arg9[%c0_27, %c0_28], %43 {strides = array<i32>} : memref<2x1xf32, #tpu.memory_space<vmem>>, vector<2x1xf32>,
    return
  }
  func.func @transform_0(%arg0: i32) -> (i32, i32, i32) {
    %c0_i32 = arith.constant 0 : i32
    %c0_i32_0 = arith.constant 0 : i32
    %c0_i32_1 = arith.constant 0 : i32
    return %arg0, %c0_i32, %c0_i32_0 : i32, i32, i32
  }
  func.func @transform_1(%arg0: i32) -> (i32, i32) {
    %c0_i32 = arith.constant 0 : i32
    %c0_i32_0 = arith.constant 0 : i32
    return %arg0, %c0_i32 : i32, i32
  }
  func.func @transform_2(%arg0: i32) -> (i32, i32) {
    %c0_i32 = arith.constant 0 : i32
    %c0_i32_0 = arith.constant 0 : i32
    %c0_i32_1 = arith.constant 0 : i32
    return %c0_i32, %c0_i32_0 : i32, i32
  }
  func.func @transform_3(%arg0: i32) -> (i32, i32) {
    %c0_i32 = arith.constant 0 : i32
    %c0_i32_0 = arith.constant 0 : i32
    %c0_i32_1 = arith.constant 0 : i32
    return %c0_i32, %c0_i32_0 : i32, i32
  }
  func.func @transform_4(%arg0: i32) -> (i32, i32) {
    %c0_i32 = arith.constant 0 : i32
    %c0_i32_0 = arith.constant 0 : i32
    %c0_i32_1 = arith.constant 0 : i32
    return %c0_i32, %c0_i32_0 : i32, i32
  }
  func.func @transform_5(%arg0: i32) -> (i32, i32) {
    %c0_i32 = arith.constant 0 : i32
    %c0_i32_0 = arith.constant 0 : i32
    %c0_i32_1 = arith.constant 0 : i32
    return %c0_i32, %c0_i32_0 : i32, i32
  }
  func.func @transform_6(%arg0: i32) -> (i32, i32) {
    %c0_i32 = arith.constant 0 : i32
    %c0_i32_0 = arith.constant 0 : i32
    %c0_i32_1 = arith.constant 0 : i32
    return %c0_i32, %c0_i32_0 : i32, i32
  }
  func.func @transform_7(%arg0: i32) -> (i32, i32) {
    %c0_i32 = arith.constant 0 : i32
    %c0_i32_0 = arith.constant 0 : i32
    return %arg0, %c0_i32 : i32, i32
  }
  func.func @transform_8(%arg0: i32) -> (i32, i32) {
    %c0_i32 = arith.constant 0 : i32
    %c0_i32_0 = arith.constant 0 : i32
    return %arg0, %c0_i32 : i32, i32
  }
}

</mosaic_0001>

<bundles_post_ra>
// kernel: tpu_custom_call.1
= control target key start
LH: loop header
LB: loop body
LE: loop exit
PB: predicated region body
PF: predicated region fallthrough
CT: control target
= control target key end

     0   :  { %s455_s0 = inlined_call_operand.vmem [shape: f32[2,8,32], index: 0, kind: input, shape index: {}]   ;;  %s456_s1 = inlined_call_operand.vmem [shape: f32[2,8], index: 1, kind: input, shape index: {}]   ;;  %s457_s2 = inlined_call_operand.vmem [shape: bf16[32,16], index: 2, kind: input, shape index: {}]   ;;  %s458_s3 = inlined_call_operand.vmem [shape: f32[1,16], index: 3, kind: input, shape index: {}]   ;;  %s459_s4 = inlined_call_operand.vmem [shape: f32[1,16], index: 4, kind: input, shape index: {}]   ;;  %s460_s5 = inlined_call_operand.vmem [shape: bf16[32,1], index: 5, kind: input, shape index: {}]   ;;  %s461_s6 = inlined_call_operand.<no memory space> [shape: f32[1,1], index: 6, kind: input, shape index: {}]   ;;  %s462_s7 = inlined_call_operand.hbm [shape: f32[2,8], index: 7, kind: output, shape index: {0}]   ;;  %s463_s8 = inlined_call_operand.vmem [shape: f32[2,1], index: 8, kind: output, shape index: {1}]  }
   0x1   :  { %v14_v0 = vstv %s461_s6 }
   0x2   :  { %15 = vst [vmem:[#allocation2] sm:$0x1] %v14_v0 }
   0x3   :  { %v314_v1 = vld [vmem:[%s457_s2 + $0x8] sm:$0xff]   ;;  %v348_v2 = vmov 0.0   ;;  %v315_v3 = vld [vmem:[%s457_s2] sm:$0xff]   ;;  %vm349_vm0 = vmmov 0  }
   0x4   :  { %295 = vmatprep.subr.bf16.mxu0 %v348_v2  ;;  %303 = vmatprep.subr.bf16.mxu1 %v348_v2  ;;  %v411_v4 = vld [vmem:[%s455_s0] sm:$0xff]  ;;  %v416_v5 = vld [vmem:[%s455_s0 + $0x8] sm:$0xff] }
   0x5   :  { %296 = vmatpush3.bf16.msra.mxu0 %v314_v1  ;;  %299 = vmatprep.mubr.msk.bf16.mxu0 %vm349_vm0, %v348_v2 }
   0x6   :  { %297 = vmatprep.subr.bf16.mxu0 %v348_v2  ;;  %307 = vmatprep.mubr.msk.bf16.mxu1 %vm349_vm0, %v348_v2 }
   0x7   :  { %16 = vsyncpa [#allocation4], 0  ;;  %v34_v6 = vpack.c.bf16 %v416_v5, %v411_v4  ;;  %vm58_vm1 = vcmask 261120   ;;  %v280_v7 = vld [vmem:[%s458_s3] ss:$0 sm:$0xff]  ;;  %vm114_vm2 = vcmask 130048   ;;  %v125_v21 = vlaneseq }
   0x8   :  { %v284_v14 = vld [vmem:[%s459_s4] ss:$0 sm:$0xff]  ;;  %vm135_vm3 = vcmask 1041409   ;;  %vm139_vm5 = vcmask 58368   ;;  %v316_v45 = vld [vmem:[%s460_s5 + $0x8] sm:$0xff]  }
   0x9   :  { %298 = vmatpush3.bf16.msra.mxu0 %v315_v3  ;;  %v126_v22 = vand.u32 127, %v125_v21  ;;  %v128_v23 = vshrl.u32 %v125_v21, 7  ;;  %v121_v26 = vld [vmem:[%s456_s1] sm:$0x3]  ;;  %304 = vmatpush3.bf16.msra.mxu1 %v316_v45 }
   0xa   :  { %vm122_vm4 = vcmp.gt.f32.partialorder %v121_v26, 0.0  ;;  %305 = vmatprep.subr.bf16.mxu1 %v348_v2  ;;  %v317_v46 = vld [vmem:[%s460_s5] sm:$0xff]   ;;  %s350_s5 = smov [#allocation3]  }
   0xb   :  { %v129_v25 = vsub.s32 %v126_v22, %v128_v23  ;;  %v163_v39 = vsub.s32 1, %v128_v23  ;;  %v156_v40 = vsub.s32 0, %v128_v23  ;;  %s268_s19 = sshll.u32 %s350_s5, 4  ;;  %s269_s19 = int_to_ptr.vmem [resolvable:$true] %s268_s19 }
   0xc   :  { %300 = vmatmul.mubr.msk.bf16.vlgmr.msra.gmra.mxu0 %vm58_vm1, %v34_v6  ;;  %s326_s20 = scalar_lea.vmem %s269_s19, 32  ;;  %p331_p1 = scmp.lt.s32.totalorder %s269_s19, %s269_s19 }
   0xd   :  { %306 = vmatpush3.bf16.msra.mxu1 %v317_v46  ;;  %p327_p0 = scmp.ne.s32.totalorder %s269_s19, %s326_s20  ;;  %p332_p2 = scmp.lt.s32.totalorder %s326_s20, %s326_s20 }
   0xf   :  { %p333_p3 = por %p332_p2, %p331_p1 }
  0x11   :  { %p334_p4 = pnand %p333_p3, %p327_p0 }
  0xcc   :  { %v96_v8 = vpop.f32.mrf.mxu0 }
  0xcd   :  { %v97_v9 = vadd.f32 %v280_v7, %v96_v8 }
  0xce   :  { %v301_v10 = vpop.f32.mrf.mxu0 }
  0xcf   :  { %318 = vtanh.f32 %v97_v9 }
  0xd0   :  { %v99_v11 = vpop.f32.mrf.mxu0 }
  0xd1   :  { %v100_v12 = vadd.f32 %v280_v7, %v99_v11 }
  0xd2   :  { %v302_v13 = vpop.f32.mrf.mxu0 }
  0xd3   :  { %320 = vtanh.f32 %v100_v12 }
  0xdc   :  { %v319_v15 = vpop.eup %318 }
  0xdd   :  { %v112_v16 = vmul.f32 %v319_v15, %v284_v14 }
  0xdf   :  { %v115_v17 = vsel %vm114_vm2, %v112_v16, 0.0 }
  0xe0   :  { %v321_v18 = vpop.eup %320  ;;  %116 = vadd.xlane.f32.xlu0 %v115_v17 }
  0xe1   :  { %v113_v19 = vmul.f32 %v321_v18, %v284_v14 }
  0xe3   :  { %v118_v20 = vsel %vm114_vm2, %v113_v19, 0.0 }
  0xe4   :  { %119 = vadd.xlane.f32.xlu0 %v118_v20 }
 0x169   :  { %v117_v24 = vpop.xlane.xlu0 %116 }
 0x16a   :  { %v130_v28 = vrot.slane %v117_v24, %v129_v25 }
 0x16d   :  { %v120_v27 = vpop.xlane.xlu0 %119 }
 0x16e   :  { %v134_v29 = vrot.slane %v120_v27, %v129_v25 }
 0x170   :  { %v136_v30 = vsel %vm135_vm3, %v134_v29, %v130_v28 }
 0x171   :  { %v138_v31 = vsel %vm122_vm4, -1e+30, %v136_v30 }
 0x172   :  { %v140_v32 = vsel %vm139_vm5, %v138_v31, -inf }
 0x173   :  { %141 = vmax.xlane.f32.xlu1 %v140_v32 }
 0x1fc   :  { %v142_v33 = vpop.xlane.xlu1 %141 }
 0x1fd   :  { %v143_v34 = vsub.f32 %v138_v31, %v142_v33 }
 0x1ff   :  { %v144_v35 = vmul.f32 1.442695, %v143_v34 }
 0x201   :  { %322 = vpow2.f32 %v144_v35 }
 0x20e   :  { %v323_v36 = vpop.eup %322 }
 0x20f   :  { %v146_v37 = vsel %vm139_vm5, %v323_v36, 0.0 }
 0x210   :  { %147 = vadd.xlane.f32.xlu1 %v146_v37 }
 0x299   :  { %v148_v38 = vpop.xlane.xlu1 %147 }
 0x29a   :  { %324 = vrcp.f32 %v148_v38 }
 0x2a7   :  { %v325_v41 = vpop.eup %324 }
 0x2a8   :  { %v150_v42 = vmul.f32 %v325_v41, %v323_v36 }
 0x2aa   :  { %v164_v43 = vrot.slane %v150_v42, %v163_v39  ;;  %151 = vst.msk [vmem:[#allocation3] sm:$0x3] %vm139_vm5, %v150_v42  ;;  %v157_v44 = vrot.slane %v150_v42, %v156_v40 }
 0x2ac   :  { %166 = vbcast.lane.b32.xlu1 %v164_v43, 256  ;;  %159 = vbcast.lane.b32.xlu0 %v157_v44, 256 }
 0x31e   :  { %v167_v47 = vpop.permute.xlu1 %166  ;;  %v160_v48 = vpop.permute.xlu0 %159 }
 0x31f   :  { %v169_v49 = vmul.f32 %v167_v47, %v416_v5  ;;  %v168_v50 = vmul.f32 %v160_v48, %v411_v4 }
 0x321   :  { %v177_v51 = vsel %vm58_vm1, %v169_v49, 0.0  ;;  %v170_v52 = vsel %vm58_vm1, %v168_v50, 0.0 }
 0x322   :  { %v178_v53 = vrot.slane %v177_v51, 4  ;;  %v171_v54 = vrot.slane %v170_v52, 4 }
 0x324   :  { %v179_v55 = vadd.f32 %v178_v53, %v177_v51  ;;  %v172_v56 = vadd.f32 %v171_v54, %v170_v52 }
 0x326   :  { %v180_v57 = vrot.slane %v179_v55, 2  ;;  %v173_v58 = vrot.slane %v172_v56, 2 }
 0x328   :  { %v181_v59 = vadd.f32 %v180_v57, %v179_v55  ;;  %v174_v60 = vadd.f32 %v173_v58, %v172_v56 }
 0x32a   :  { %v182_v61 = vrot.slane %v181_v59, 1  ;;  %v175_v62 = vrot.slane %v174_v60, 1 }
 0x32c   :  { %v183_v63 = vadd.f32 %v182_v61, %v181_v59  ;;  %v176_v0 = vadd.f32 %v175_v62, %v174_v60 }
 0x32e   :  { %v187_v1 = vpack.c.bf16 %v183_v63, %v183_v63  ;;  %v186_v2 = vpack.c.bf16 %v176_v0, %v176_v0 }
 0x330   :  { %v202_v3 = vunpack.c.l.b16 %v187_v1  ;;  %v201_v4 = vunpack.c.l.b16 %v186_v2 }
 0x332   :  { %v203_v5 = vsel %vm135_vm3, %v202_v3, %v201_v4 }
 0x333   :  { %v204_v6 = vpack.c.b16 %v203_v5, %v203_v5 }
 0x335   :  { %308 = vmatmul.mubr.msk.bf16.vlgmr.msra.gmra.mxu1 %vm58_vm1, %v204_v6 }
 0x336   :  { %337 = shalt.err (!%p334_p4)
}
 0x337   :  { %271 = dma.vmem_to_hbm [thread:$0]  %s269_s19, 32, %s462_s7, [#allocation4]   ;;  %v285_v7 = vld [vmem:[#allocation2] ss:$0 sm:$0xff]  ;;  %vm260_vm6 = vcmask 1024  }
 0x3f5   :  { %v254_v8 = vpop.f32.mrf.mxu1 }
 0x3f6   :  { %v255_v9 = vadd.f32 %v285_v7, %v254_v8 }
 0x3f7   :  { %v309_v10 = vpop.f32.mrf.mxu1 }
 0x3f8   :  { %261 = vst.msk [vmem:[%s463_s8] sm:$0x3] %vm260_vm6, %v255_v9 }
 0x3f9   :  { %v257_v11 = vpop.f32.mrf.mxu1 }
 0x3fb   :  { %v310_v12 = vpop.f32.mrf.mxu1 }
 0x3fc   :  { %346 = dma.done.wait [#allocation4], 32  }
 0x3fd   :  { %347 = vsyncadd [#allocation4], 4294967264 }
 0x3fe   :  { %279 = vsyncpa [#allocation4], 1 }

</bundles_post_ra>
